<compile_context>
chip_gen: v6e
topology: v6e:2x2x1
jax: 0.10.0
libtpu: 0.0.40
codegen_flags: <defaults>
</compile_context>

<pallas_src>
import functools

import jax
import jax.numpy as jnp
from jax.experimental import pallas as pl
from jax.experimental.pallas import tpu as pltpu

# ---------------------------------------------------------------------------
# Model hyper-parameters (small, consistent with the module's forward)
# ---------------------------------------------------------------------------
N_CATEGORIES = 4      # in the original script this is len(all_categories)
INPUT_SIZE   = 16
HIDDEN_SIZE  = 32
OUTPUT_SIZE  = 20
BATCH        = 2
SEQ_LEN      = 8

HO      = HIDDEN_SIZE + OUTPUT_SIZE     # fused [i2h | i2o] output width (52)
OUT_PAD = 128                           # lane-dense padded logits width
B_PAD   = 8                             # sublane-dense padded batch
NEG_BIG = -1e30                         # mask value for padded logit lanes


# ---------------------------------------------------------------------------
# Pallas kernel: whole sequence in one invocation, recurrence fully unrolled
# ---------------------------------------------------------------------------
def rnn_seq_kernel(
    cat_ref,       # (B_PAD, N_CAT)        one-hot category (time-invariant)
    x_ref,         # (T*B_PAD, IN)         all timestep inputs, flattened
    h0_ref,        # (B_PAD, H)            initial hidden
    w_cat_ref,     # (N_CAT, HO)           fused [W_i2h^T|W_i2o^T] rows: category
    w_x_ref,       # (IN, HO)              fused rows acting on x_t
    w_h_ref,       # (H, HO)               fused rows acting on hidden
    b_fused_ref,   # (1, HO)               [b_i2h | b_i2o]
    w_o2o_ref,     # (HO, OUT_PAD)         W_o2o^T, zero-padded lanes
    b_o2o_ref,     # (1, OUT_PAD)          b_o2o, padded lanes = -1e30
    out_ref,       # (T*B_PAD, OUT_PAD)    all-step log-softmax outputs
    hfin_ref,      # (B_PAD, H)            final hidden state
    comb_scratch,  # VMEM (T*B_PAD, HO)    per-step cat(hidden_new, i2o_out)
    *, seq_len, b_pad, hidden_size,
):
    # Per-sequence bias from the time-invariant category features (computed once):
    #   cat_bias = category @ W_cat + [b_i2h | b_i2o]
    cat_bias = (
        jnp.dot(cat_ref[...], w_cat_ref[...], preferred_element_type=jnp.float32)
        + b_fused_ref[...]
    )                                                     # (B_PAD, HO)

    # Hoisted input projection for ALL timesteps: one batched matmul, off the
    # serial recurrence chain.
    xproj = jnp.dot(x_ref[...], w_x_ref[...],
                    preferred_element_type=jnp.float32)   # (T*B_PAD, HO)

    w_h = w_h_ref[...]                                    # (H, HO), stays in vregs
    h = h0_ref[...]                                       # (B_PAD, H)

    # Serial recurrence, fully unrolled. Per step only: h @ W_h + adds.
    # combined == cat(hidden_new, i2o_output) == the operand of o2o.
    for t in range(seq_len):
        combined = (
            jnp.dot(h, w_h, preferred_element_type=jnp.float32)
            + xproj[t * b_pad:(t + 1) * b_pad, :]
            + cat_bias
        )                                                 # (B_PAD, HO)
        comb_scratch[pl.ds(t * b_pad, b_pad), :] = combined
        h = combined[:, :hidden_size]                     # new hidden

    hfin_ref[...] = h

    # Deferred output head: one matmul + one batched log-softmax for all steps.
    comb_all = comb_scratch[...]                          # (T*B_PAD, HO)
    logits = (
        jnp.dot(comb_all, w_o2o_ref[...], preferred_element_type=jnp.float32)
        + b_o2o_ref[...]
    )                                                     # (T*B_PAD, OUT_PAD)

    # dropout(p=0.1): eval-mode => identity
    # TODO(synk): training-mode dropout (random mask + 1/(1-p) scale) not applied.

    # log_softmax(dim=1); padded lanes carry -1e30 bias => exp underflows to 0.
    m = jnp.max(logits, axis=1, keepdims=True)
    lse = m + jnp.log(jnp.sum(jnp.exp(logits - m), axis=1, keepdims=True))
    out_ref[...] = logits - lse


# ---------------------------------------------------------------------------
# One-time parameter preparation (transpose / fuse / pad). Do NOT redo per call.
# ---------------------------------------------------------------------------
def prepare_params(params):
    O = OUTPUT_SIZE

    # Fuse i2h and i2o along the output dim; pre-transpose to (in_f, out_f).
    w_in_fused_t = jnp.concatenate(
        [params["w_i2h"], params["w_i2o"]], axis=0).T           # (C1, HO)
    w_cat = w_in_fused_t[:N_CATEGORIES, :]                      # (N_CAT, HO)
    w_x = w_in_fused_t[N_CATEGORIES:N_CATEGORIES + INPUT_SIZE, :]  # (IN, HO)
    w_h = w_in_fused_t[N_CATEGORIES + INPUT_SIZE:, :]           # (H, HO)
    b_fused = jnp.concatenate(
        [params["b_i2h"], params["b_i2o"]]).reshape(1, HO)

    # o2o: pre-transpose and lane-pad to 128; padded lanes get -1e30 bias so
    # the in-kernel log-softmax over the padded tile stays exact.
    w_o2o_p = jnp.pad(params["w_o2o"].T, ((0, 0), (0, OUT_PAD - O)))
    b_o2o_p = jnp.concatenate(
        [params["b_o2o"], jnp.full((OUT_PAD - O,), NEG_BIG, jnp.float32)]
    ).reshape(1, OUT_PAD)

    return {
        "w_cat": w_cat, "w_x": w_x, "w_h": w_h, "b_fused": b_fused,
        "w_o2o": w_o2o_p, "b_o2o": b_o2o_p,
    }


# ---------------------------------------------------------------------------
# Python wrapper: ONE pallas_call (single invocation) for the whole sequence
# ---------------------------------------------------------------------------
@jax.jit
def rnn_forward_seq(category, xs, hidden0, prep):
    """category: (B, n_cat), xs: (T, B, input), hidden0: (B, H)
       -> (log_probs (T, B, O), final hidden (B, H))."""
    T, B, _ = xs.shape
    pad_b = B_PAD - B

    # Pad batch (sublane) dim to 8 so all vregs / stores are dense.
    cat_p = jnp.pad(category, ((0, pad_b), (0, 0)))
    h0_p = jnp.pad(hidden0, ((0, pad_b), (0, 0)))
    xs_p = jnp.pad(xs, ((0, 0), (0, pad_b), (0, 0))).reshape(T * B_PAD, INPUT_SIZE)

    kernel = functools.partial(
        rnn_seq_kernel, seq_len=T, b_pad=B_PAD, hidden_size=HIDDEN_SIZE)

    out_flat, hidden_final = pl.pallas_call(
        kernel,
        out_shape=(
            jax.ShapeDtypeStruct((T * B_PAD, OUT_PAD), jnp.float32),
            jax.ShapeDtypeStruct((B_PAD, HIDDEN_SIZE), jnp.float32),
        ),
        # No grid: single invocation, whole arrays as VMEM blocks (footprint ~50 KB).
        scratch_shapes=[pltpu.VMEM((T * B_PAD, HO), jnp.float32)],
    )(cat_p, xs_p, h0_p,
      prep["w_cat"], prep["w_x"], prep["w_h"], prep["b_fused"],
      prep["w_o2o"], prep["b_o2o"])

    log_probs = out_flat.reshape(T, B_PAD, OUT_PAD)[:, :B, :OUTPUT_SIZE]
    return log_probs, hidden_final[:B]


# ---------------------------------------------------------------------------
# Deterministic parameter init (PyTorch nn.Linear-style uniform(-1/sqrt(k), 1/sqrt(k)))
# ---------------------------------------------------------------------------
def init_params(key):
    c1 = N_CATEGORIES + INPUT_SIZE + HIDDEN_SIZE
    c2 = HIDDEN_SIZE + OUTPUT_SIZE
    keys = jax.random.split(key, 6)

    def lin(kw, kb, out_f, in_f):
        bound = 1.0 / (in_f ** 0.5)
        w = jax.random.uniform(kw, (out_f, in_f), jnp.float32, -bound, bound)
        b = jax.random.uniform(kb, (out_f,), jnp.float32, -bound, bound)
        return w, b

    w_i2h, b_i2h = lin(keys[0], keys[1], HIDDEN_SIZE, c1)
    w_i2o, b_i2o = lin(keys[2], keys[3], OUTPUT_SIZE, c1)
    w_o2o, b_o2o = lin(keys[4], keys[5], OUTPUT_SIZE, c2)
    return {
        "w_i2h": w_i2h, "b_i2h": b_i2h,
        "w_i2o": w_i2o, "b_i2o": b_i2o,
        "w_o2o": w_o2o, "b_o2o": b_o2o,
    }


# ---------------------------------------------------------------------------
# Pure-JAX reference (exact PyTorch forward semantics, per step)
# ---------------------------------------------------------------------------
def ref_forward_seq(category, xs, hidden0, params):
    h = hidden0
    outs = []
    for t in range(xs.shape[0]):
        combined = jnp.concatenate([category, xs[t], h], axis=1)
        h_new = combined @ params["w_i2h"].T + params["b_i2h"]
        o1 = combined @ params["w_i2o"].T + params["b_i2o"]
        oc = jnp.concatenate([h_new, o1], axis=1)
        o2 = oc @ params["w_o2o"].T + params["b_o2o"]
        outs.append(jax.nn.log_softmax(o2, axis=1))
        h = h_new
    return jnp.stack(outs), h


if __name__ == "__main__":
    key = jax.random.PRNGKey(0)
    k_par, k_cat, k_x = jax.random.split(key, 3)

    params = init_params(k_par)
    prep = prepare_params(params)          # one-time transpose/fuse/pad

    category = jax.nn.one_hot(
        jax.random.randint(k_cat, (BATCH,), 0, N_CATEGORIES), N_CATEGORIES
    ).astype(jnp.float32)                                         # (B, n_cat)
    xs = jax.random.normal(k_x, (SEQ_LEN, BATCH, INPUT_SIZE), jnp.float32)
    hidden0 = jnp.zeros((BATCH, HIDDEN_SIZE), jnp.float32)        # initHidden()

    log_probs, hidden_T = rnn_forward_seq(category, xs, hidden0, prep)
    jax.block_until_ready((log_probs, hidden_T))

    # Shape / normalization sanity.
    assert log_probs.shape == (SEQ_LEN, BATCH, OUTPUT_SIZE)
    assert hidden_T.shape == (BATCH, HIDDEN_SIZE)
    row_sums = jnp.exp(log_probs).sum(axis=-1)
    assert jnp.allclose(row_sums, 1.0, atol=1e-4), row_sums

    # Numerical check against the pure-JAX reference of the PyTorch forward.
    ref_lp, ref_h = ref_forward_seq(category, xs, hidden0, params)
    assert jnp.allclose(log_probs, ref_lp, atol=2e-3, rtol=2e-3), (
        jnp.max(jnp.abs(log_probs - ref_lp)))
    assert jnp.allclose(hidden_T, ref_h, atol=2e-3, rtol=2e-3), (
        jnp.max(jnp.abs(hidden_T - ref_h)))

    print("KERNEL_OK")
</pallas_src>

<mosaic_0001>
module attributes {stable_mosaic.version = 11 : i64} {
  func.func @rnn_seq_kernel(%arg0: memref<8x4xf32, #tpu.memory_space<vmem>>, %arg1: memref<64x16xf32, #tpu.memory_space<vmem>>, %arg2: memref<8x32xf32, #tpu.memory_space<vmem>>, %arg3: memref<4x52xf32, #tpu.memory_space<vmem>>, %arg4: memref<16x52xf32, #tpu.memory_space<vmem>>, %arg5: memref<32x52xf32, #tpu.memory_space<vmem>>, %arg6: memref<1x52xf32, #tpu.memory_space<vmem>>, %arg7: memref<52x128xf32, #tpu.memory_space<vmem>>, %arg8: memref<1x128xf32, #tpu.memory_space<vmem>>, %arg9: memref<64x128xf32, #tpu.memory_space<vmem>>, %arg10: memref<8x32xf32, #tpu.memory_space<vmem>>, %arg11: memref<64x52xf32, #tpu.memory_space<vmem>>) attributes {dimension_semantics = [], scalar_prefetch = 0 : i64, scratch_operands = 1 : i64, tpu.core_type = #tpu.core_type<tc>} {
    %c0 = arith.constant 0 : index
    %c0_0 = arith.constant 0 : index
    %0 = vector.load %arg0[%c0, %c0_0] : memref<8x4xf32, #tpu.memory_space<vmem>>, vector<8x4xf32>
    %c0_1 = arith.constant 0 : index
    %c0_2 = arith.constant 0 : index
    %1 = vector.load %arg3[%c0_1, %c0_2] : memref<4x52xf32, #tpu.memory_space<vmem>>, vector<4x52xf32>
    %cst = arith.constant dense<0.000000e+00> : vector<8x52xf32>
    %2 = tpu.matmul %0, %1, %cst {dimension_numbers = #tpu.dot_dimension_numbers<[1], [0], [0], [1], [0, 0, 1, 1], [], []>} : vector<8x4xf32>, vector<4x52xf32>, vector<8x52xf32> -> vector<8x52xf32>
    %c0_3 = arith.constant 0 : index
    %c0_4 = arith.constant 0 : index
    %3 = vector.load %arg6[%c0_3, %c0_4] : memref<1x52xf32, #tpu.memory_space<vmem>>, vector<1x52xf32>
    %4 = vector.broadcast %3 : vector<1x52xf32> to vector<8x52xf32>
    %5 = arith.addf %2, %4 : vector<8x52xf32>
    %c0_5 = arith.constant 0 : index
    %c0_6 = arith.constant 0 : index
    %6 = vector.load %arg1[%c0_5, %c0_6] : memref<64x16xf32, #tpu.memory_space<vmem>>, vector<64x16xf32>
    %c0_7 = arith.constant 0 : index
    %c0_8 = arith.constant 0 : index
    %7 = vector.load %arg4[%c0_7, %c0_8] : memref<16x52xf32, #tpu.memory_space<vmem>>, vector<16x52xf32>
    %cst_9 = arith.constant dense<0.000000e+00> : vector<64x52xf32>
    %8 = tpu.matmul %6, %7, %cst_9 {dimension_numbers = #tpu.dot_dimension_numbers<[1], [0], [0], [1], [0, 0, 1, 1], [], []>} : vector<64x16xf32>, vector<16x52xf32>, vector<64x52xf32> -> vector<64x52xf32>
    %c0_10 = arith.constant 0 : index
    %c0_11 = arith.constant 0 : index
    %9 = vector.load %arg5[%c0_10, %c0_11] : memref<32x52xf32, #tpu.memory_space<vmem>>, vector<32x52xf32>
    %c0_12 = arith.constant 0 : index
    %c0_13 = arith.constant 0 : index
    %10 = vector.load %arg2[%c0_12, %c0_13] : memref<8x32xf32, #tpu.memory_space<vmem>>, vector<8x32xf32>
    %cst_14 = arith.constant dense<0.000000e+00> : vector<8x52xf32>
    %11 = tpu.matmul %10, %9, %cst_14 {dimension_numbers = #tpu.dot_dimension_numbers<[1], [0], [0], [1], [0, 0, 1, 1], [], []>} : vector<8x32xf32>, vector<32x52xf32>, vector<8x52xf32> -> vector<8x52xf32>
    %12 = vector.extract_strided_slice %8 {offsets = [0, 0], sizes = [8, 52], strides = [1, 1]} : vector<64x52xf32> to vector<8x52xf32>
    %13 = arith.addf %11, %12 : vector<8x52xf32>
    %14 = arith.addf %13, %5 : vector<8x52xf32>
    %c0_15 = arith.constant 0 : index
    %c0_16 = arith.constant 0 : index
    %15 = vector.load %arg11[%c0_15, %c0_16] : memref<64x52xf32, #tpu.memory_space<vmem>>, vector<8x52xf32>
    tpu.vector_store %arg11[%c0_15, %c0_16], %14 {strides = array<i32>} : memref<64x52xf32, #tpu.memory_space<vmem>>, vector<8x52xf32>,
    %16 = vector.extract_strided_slice %14 {offsets = [0, 0], sizes = [8, 32], strides = [1, 1]} : vector<8x52xf32> to vector<8x32xf32>
    %cst_17 = arith.constant dense<0.000000e+00> : vector<8x52xf32>
    %17 = tpu.matmul %16, %9, %cst_17 {dimension_numbers = #tpu.dot_dimension_numbers<[1], [0], [0], [1], [0, 0, 1, 1], [], []>} : vector<8x32xf32>, vector<32x52xf32>, vector<8x52xf32> -> vector<8x52xf32>
    %18 = vector.extract_strided_slice %8 {offsets = [8, 0], sizes = [8, 52], strides = [1, 1]} : vector<64x52xf32> to vector<8x52xf32>
    %19 = arith.addf %17, %18 : vector<8x52xf32>
    %20 = arith.addf %19, %5 : vector<8x52xf32>
    %c8 = arith.constant 8 : index
    %c0_18 = arith.constant 0 : index
    %21 = vector.load %arg11[%c8, %c0_18] : memref<64x52xf32, #tpu.memory_space<vmem>>, vector<8x52xf32>
    tpu.vector_store %arg11[%c8, %c0_18], %20 {strides = array<i32>} : memref<64x52xf32, #tpu.memory_space<vmem>>, vector<8x52xf32>,
    %22 = vector.extract_strided_slice %20 {offsets = [0, 0], sizes = [8, 32], strides = [1, 1]} : vector<8x52xf32> to vector<8x32xf32>
    %cst_19 = arith.constant dense<0.000000e+00> : vector<8x52xf32>
    %23 = tpu.matmul %22, %9, %cst_19 {dimension_numbers = #tpu.dot_dimension_numbers<[1], [0], [0], [1], [0, 0, 1, 1], [], []>} : vector<8x32xf32>, vector<32x52xf32>, vector<8x52xf32> -> vector<8x52xf32>
    %24 = vector.extract_strided_slice %8 {offsets = [16, 0], sizes = [8, 52], strides = [1, 1]} : vector<64x52xf32> to vector<8x52xf32>
    %25 = arith.addf %23, %24 : vector<8x52xf32>
    %26 = arith.addf %25, %5 : vector<8x52xf32>
    %c16 = arith.constant 16 : index
    %c0_20 = arith.constant 0 : index
    %27 = vector.load %arg11[%c16, %c0_20] : memref<64x52xf32, #tpu.memory_space<vmem>>, vector<8x52xf32>
    tpu.vector_store %arg11[%c16, %c0_20], %26 {strides = array<i32>} : memref<64x52xf32, #tpu.memory_space<vmem>>, vector<8x52xf32>,
    %28 = vector.extract_strided_slice %26 {offsets = [0, 0], sizes = [8, 32], strides = [1, 1]} : vector<8x52xf32> to vector<8x32xf32>
    %cst_21 = arith.constant dense<0.000000e+00> : vector<8x52xf32>
    %29 = tpu.matmul %28, %9, %cst_21 {dimension_numbers = #tpu.dot_dimension_numbers<[1], [0], [0], [1], [0, 0, 1, 1], [], []>} : vector<8x32xf32>, vector<32x52xf32>, vector<8x52xf32> -> vector<8x52xf32>
    %30 = vector.extract_strided_slice %8 {offsets = [24, 0], sizes = [8, 52], strides = [1, 1]} : vector<64x52xf32> to vector<8x52xf32>
    %31 = arith.addf %29, %30 : vector<8x52xf32>
    %32 = arith.addf %31, %5 : vector<8x52xf32>
    %c24 = arith.constant 24 : index
    %c0_22 = arith.constant 0 : index
    %33 = vector.load %arg11[%c24, %c0_22] : memref<64x52xf32, #tpu.memory_space<vmem>>, vector<8x52xf32>
    tpu.vector_store %arg11[%c24, %c0_22], %32 {strides = array<i32>} : memref<64x52xf32, #tpu.memory_space<vmem>>, vector<8x52xf32>,
    %34 = vector.extract_strided_slice %32 {offsets = [0, 0], sizes = [8, 32], strides = [1, 1]} : vector<8x52xf32> to vector<8x32xf32>
    %cst_23 = arith.constant dense<0.000000e+00> : vector<8x52xf32>
    %35 = tpu.matmul %34, %9, %cst_23 {dimension_numbers = #tpu.dot_dimension_numbers<[1], [0], [0], [1], [0, 0, 1, 1], [], []>} : vector<8x32xf32>, vector<32x52xf32>, vector<8x52xf32> -> vector<8x52xf32>
    %36 = vector.extract_strided_slice %8 {offsets = [32, 0], sizes = [8, 52], strides = [1, 1]} : vector<64x52xf32> to vector<8x52xf32>
    %37 = arith.addf %35, %36 : vector<8x52xf32>
    %38 = arith.addf %37, %5 : vector<8x52xf32>
    %c32 = arith.constant 32 : index
    %c0_24 = arith.constant 0 : index
    %39 = vector.load %arg11[%c32, %c0_24] : memref<64x52xf32, #tpu.memory_space<vmem>>, vector<8x52xf32>
    tpu.vector_store %arg11[%c32, %c0_24], %38 {strides = array<i32>} : memref<64x52xf32, #tpu.memory_space<vmem>>, vector<8x52xf32>,
    %40 = vector.extract_strided_slice %38 {offsets = [0, 0], sizes = [8, 32], strides = [1, 1]} : vector<8x52xf32> to vector<8x32xf32>
    %cst_25 = arith.constant dense<0.000000e+00> : vector<8x52xf32>
    %41 = tpu.matmul %40, %9, %cst_25 {dimension_numbers = #tpu.dot_dimension_numbers<[1], [0], [0], [1], [0, 0, 1, 1], [], []>} : vector<8x32xf32>, vector<32x52xf32>, vector<8x52xf32> -> vector<8x52xf32>
    %42 = vector.extract_strided_slice %8 {offsets = [40, 0], sizes = [8, 52], strides = [1, 1]} : vector<64x52xf32> to vector<8x52xf32>
    %43 = arith.addf %41, %42 : vector<8x52xf32>
    %44 = arith.addf %43, %5 : vector<8x52xf32>
    %c40 = arith.constant 40 : index
    %c0_26 = arith.constant 0 : index
    %45 = vector.load %arg11[%c40, %c0_26] : memref<64x52xf32, #tpu.memory_space<vmem>>, vector<8x52xf32>
    tpu.vector_store %arg11[%c40, %c0_26], %44 {strides = array<i32>} : memref<64x52xf32, #tpu.memory_space<vmem>>, vector<8x52xf32>,
    %46 = vector.extract_strided_slice %44 {offsets = [0, 0], sizes = [8, 32], strides = [1, 1]} : vector<8x52xf32> to vector<8x32xf32>
    %cst_27 = arith.constant dense<0.000000e+00> : vector<8x52xf32>
    %47 = tpu.matmul %46, %9, %cst_27 {dimension_numbers = #tpu.dot_dimension_numbers<[1], [0], [0], [1], [0, 0, 1, 1], [], []>} : vector<8x32xf32>, vector<32x52xf32>, vector<8x52xf32> -> vector<8x52xf32>
    %48 = vector.extract_strided_slice %8 {offsets = [48, 0], sizes = [8, 52], strides = [1, 1]} : vector<64x52xf32> to vector<8x52xf32>
    %49 = arith.addf %47, %48 : vector<8x52xf32>
    %50 = arith.addf %49, %5 : vector<8x52xf32>
    %c48 = arith.constant 48 : index
    %c0_28 = arith.constant 0 : index
    %51 = vector.load %arg11[%c48, %c0_28] : memref<64x52xf32, #tpu.memory_space<vmem>>, vector<8x52xf32>
    tpu.vector_store %arg11[%c48, %c0_28], %50 {strides = array<i32>} : memref<64x52xf32, #tpu.memory_space<vmem>>, vector<8x52xf32>,
    %52 = vector.extract_strided_slice %50 {offsets = [0, 0], sizes = [8, 32], strides = [1, 1]} : vector<8x52xf32> to vector<8x32xf32>
    %cst_29 = arith.constant dense<0.000000e+00> : vector<8x52xf32>
    %53 = tpu.matmul %52, %9, %cst_29 {dimension_numbers = #tpu.dot_dimension_numbers<[1], [0], [0], [1], [0, 0, 1, 1], [], []>} : vector<8x32xf32>, vector<32x52xf32>, vector<8x52xf32> -> vector<8x52xf32>
    %54 = vector.extract_strided_slice %8 {offsets = [56, 0], sizes = [8, 52], strides = [1, 1]} : vector<64x52xf32> to vector<8x52xf32>
    %55 = arith.addf %53, %54 : vector<8x52xf32>
    %56 = arith.addf %55, %5 : vector<8x52xf32>
    %c56 = arith.constant 56 : index
    %c0_30 = arith.constant 0 : index
    %57 = vector.load %arg11[%c56, %c0_30] : memref<64x52xf32, #tpu.memory_space<vmem>>, vector<8x52xf32>
    tpu.vector_store %arg11[%c56, %c0_30], %56 {strides = array<i32>} : memref<64x52xf32, #tpu.memory_space<vmem>>, vector<8x52xf32>,
    %58 = vector.extract_strided_slice %56 {offsets = [0, 0], sizes = [8, 32], strides = [1, 1]} : vector<8x52xf32> to vector<8x32xf32>
    %c0_31 = arith.constant 0 : index
    %c0_32 = arith.constant 0 : index
    %59 = vector.load %arg10[%c0_31, %c0_32] : memref<8x32xf32, #tpu.memory_space<vmem>>, vector<8x32xf32>
    tpu.vector_store %arg10[%c0_31, %c0_32], %58 {strides = array<i32>} : memref<8x32xf32, #tpu.memory_space<vmem>>, vector<8x32xf32>,
    %c0_33 = arith.constant 0 : index
    %c0_34 = arith.constant 0 : index
    %60 = vector.load %arg11[%c0_33, %c0_34] : memref<64x52xf32, #tpu.memory_space<vmem>>, vector<64x52xf32>
    %c0_35 = arith.constant 0 : index
    %c0_36 = arith.constant 0 : index
    %61 = vector.load %arg7[%c0_35, %c0_36] : memref<52x128xf32, #tpu.memory_space<vmem>>, vector<52x128xf32>
    %cst_37 = arith.constant dense<0.000000e+00> : vector<64x128xf32>
    %62 = tpu.matmul %60, %61, %cst_37 {dimension_numbers = #tpu.dot_dimension_numbers<[1], [0], [0], [1], [0, 0, 1, 1], [], []>} : vector<64x52xf32>, vector<52x128xf32>, vector<64x128xf32> -> vector<64x128xf32>
    %c0_38 = arith.constant 0 : index
    %c0_39 = arith.constant 0 : index
    %63 = vector.load %arg8[%c0_38, %c0_39] : memref<1x128xf32, #tpu.memory_space<vmem>>, vector<1x128xf32>
    %64 = vector.broadcast %63 : vector<1x128xf32> to vector<64x128xf32>
    %65 = arith.addf %62, %64 : vector<64x128xf32>
    %cst_40 = arith.constant dense<0xFF800000> : vector<64xf32>
    %66 = vector.multi_reduction <maximumf>, %65, %cst_40 [1] : vector<64x128xf32> to vector<64xf32>
    %67 = vector.shape_cast %66 : vector<64xf32> to vector<64x1xf32>
    %68 = vector.broadcast %67 : vector<64x1xf32> to vector<64x128xf32>
    %69 = arith.subf %65, %68 : vector<64x128xf32>
    %70 = math.exp %69 : vector<64x128xf32>
    %cst_41 = arith.constant dense<0.000000e+00> : vector<64xf32>
    %71 = vector.multi_reduction <add>, %70, %cst_41 [1] : vector<64x128xf32> to vector<64xf32>
    %72 = vector.shape_cast %71 : vector<64xf32> to vector<64x1xf32>
    %73 = math.log %72 : vector<64x1xf32>
    %74 = arith.addf %67, %73 : vector<64x1xf32>
    %75 = vector.broadcast %74 : vector<64x1xf32> to vector<64x128xf32>
    %76 = arith.subf %65, %75 : vector<64x128xf32>
    %c0_42 = arith.constant 0 : index
    %c0_43 = arith.constant 0 : index
    %77 = vector.load %arg9[%c0_42, %c0_43] : memref<64x128xf32, #tpu.memory_space<vmem>>, vector<64x128xf32>
    tpu.vector_store %arg9[%c0_42, %c0_43], %76 {strides = array<i32>} : memref<64x128xf32, #tpu.memory_space<vmem>>, vector<64x128xf32>,
    return
  }
}

</mosaic_0001>

<bundles_post_ra>
// kernel: rnn_forward_seq.1
= control target key start
LH: loop header
LB: loop body
LE: loop exit
PB: predicated region body
PF: predicated region fallthrough
CT: control target
= control target key end

     0   :  { %vm131_vm0 = vcmask 130048   ;;  %v1392_v3 = vmov 0.0   ;;  %vm1393_vm1 = vmmov 0   ;;  %vm47_vm2 = vcmask 1043456   ;;  %s1771_s4 = inlined_call_operand.vmem [shape: f32[16,52], index: 4, kind: input, shape index: {}]   ;;  %s1772_s1 = inlined_call_operand.vmem [shape: f32[64,16], index: 1, kind: input, shape index: {}]   ;;  %s1773_s5 = inlined_call_operand.vmem [shape: f32[32,52], index: 5, kind: input, shape index: {}]   ;;  %s1774_s3 = inlined_call_operand.vmem [shape: f32[4,52], index: 3, kind: input, shape index: {}]   ;;  %s1775_s0 = inlined_call_operand.vmem [shape: f32[8,4], index: 0, kind: input, shape index: {}]   ;;  %s1776_s2 = inlined_call_operand.vmem [shape: f32[8,32], index: 2, kind: input, shape index: {}]   ;;  %s1777_s6 = inlined_call_operand.vmem [shape: f32[1,52], index: 6, kind: input, shape index: {}]   ;;  %s1778_s7 = inlined_call_operand.vmem [shape: f32[52,128], index: 7, kind: input, shape index: {}]   ;;  %s1779_s8 = inlined_call_operand.vmem [shape: f32[1,128], index: 8, kind: input, shape index: {}]   ;;  %s1780_s10 = inlined_call_operand.vmem [shape: f32[8,32], index: 10, kind: output, shape index: {1}]   ;;  %s1781_s9 = inlined_call_operand.vmem [shape: f32[64,128], index: 9, kind: output, shape index: {0}]  }
   0x1   :  { %v130_v0 = vld [vmem:[%s1771_s4 + $0x8] sm:$0xff]  ;;  %v129_v1 = vld [vmem:[%s1771_s4] sm:$0xff]  ;;  %1223 = vmatprep.subr.mxu1 %v1392_v3  ;;  %1225 = vmatprep.mubr.msk.f32.mxu1 %vm1393_vm1, %v1392_v3  ;;  %v1468_v5 = vld [vmem:[%s1773_s5 + $0x18] sm:$0xff]  ;;  %vm43_vm3 = vcmask 31744   ;;  %vm266_vm4 = vcmask 261120   ;;  %vm341_vm5 = vcmask 424960  }
   0x2   :  { %v121_v2 = vld [vmem:[%s1772_s1] sm:$0xff]  ;;  %1228 = vmatprep.subr.mxu0 %v130_v0  ;;  %v122_v4 = vld [vmem:[%s1772_s1 + $0x8] sm:$0xff]  ;;  %v123_v6 = vld [vmem:[%s1772_s1 + $0x10] sm:$0xff] }
   0x3   :  { %1232 = vmatprep.mubr.msk.f32.mxu0 %vm131_vm0, %v121_v2  ;;  %1229 = vmatpush3.msra.mxu0 %v130_v0  ;;  %v35_v7 = vld [vmem:[%s1774_s3] sm:$0xf]  ;;  %v1481_v8 = vld [vmem:[%s1773_s5 + $0x10] sm:$0xff]  ;;  %v124_v10 = vld [vmem:[%s1772_s1 + $0x18] sm:$0xff] }
   0x4   :  { %1230 = vmatprep.subr.mxu0 %v129_v1  ;;  %v34_v9 = vld [vmem:[%s1775_s0] sm:$0xff]  ;;  %v1498_v12 = vld [vmem:[%s1773_s5 + $0x8] sm:$0xff]  ;;  %1224 = vmatpush3.msk.msra.mxu1 %vm47_vm2, %v35_v7  ;;  %v127_v15 = vld [vmem:[%s1772_s1 + $0x30] sm:$0xff] }
   0x5   :  { %1231 = vmatpush3.msra.mxu0 %v129_v1  ;;  %v125_v11 = vld [vmem:[%s1772_s1 + $0x20] sm:$0xff]  ;;  %1226 = vmatmul.mubr.msk.f32.vlgmr.msra.gmra.mxu1 %vm43_vm3, %v34_v9  ;;  %v126_v14 = vld [vmem:[%s1772_s1 + $0x28] sm:$0xff]  ;;  %v128_v16 = vld [vmem:[%s1772_s1 + $0x38] sm:$0xff] }
   0x6   :  { %1233 = vmatmul.mubr.msk.f32.vlgmr.msra.gmra.mxu0 %vm131_vm0, %v122_v4  ;;  %1244 = vmatprep.subr.mxu0 %v1392_v3  ;;  %v1507_v13 = vld [vmem:[%s1773_s5] sm:$0xff]  ;;  %v883_v50 = vld [vmem:[%s1778_s7 + $0x30] sm:$0xf]  ;;  %v882_v55 = vld [vmem:[%s1778_s7 + $0x28] sm:$0xff] }
   0x7   :  { %1245 = vmatpush3.msra.mxu0 %v1468_v5  ;;  %1235 = vmatprep.mubr.msk.f32.mxu0 %vm131_vm0, %v123_v6  ;;  %v265_v17 = vld [vmem:[%s1776_s2] sm:$0xff]  ;;  %v880_v58 = vld [vmem:[%s1778_s7 + $0x18] sm:$0xff]  ;;  %v879_v59 = vld [vmem:[%s1778_s7 + $0x10] sm:$0xff] }
   0x8   :  { %1246 = vmatprep.subr.mxu0 %v1392_v3  ;;  %1266 = vmatprep.subr.mxu1 %v1392_v3  ;;  %v1127_v27 = vld [vmem:[%s1777_s6] ss:$0 sm:$0xff]  ;;  %v878_v60 = vld [vmem:[%s1778_s7 + $0x8] sm:$0xff] }
   0x9   :  { %1247 = vmatpush3.msra.mxu0 %v1481_v8  ;;  %1267 = vmatpush3.msra.mxu1 %v1468_v5  ;;  %v881_v57 = vld [vmem:[%s1778_s7 + $0x20] sm:$0xff] }
   0xa   :  { %1236 = vmatmul.mubr.msk.f32.gmra.mxu0 %vm131_vm0, %v124_v10  ;;  %1248 = vmatprep.subr.mxu0 %v1392_v3  ;;  %v877_v61 = vld [vmem:[%s1778_s7] sm:$0xff] }
   0xb   :  { %1238 = vmatprep.mubr.msk.f32.mxu0 %vm131_vm0, %v125_v11  ;;  %1249 = vmatpush3.msra.mxu0 %v1498_v12  ;;  %v1146_v7 = vld [vmem:[%s1779_s8] ss:$0 sm:$0xff] }
   0xc   :  { %1250 = vmatprep.subr.mxu0 %v1392_v3  ;;  %1268 = vmatprep.subr.mxu1 %v1392_v3 }
   0xd   :  { %1251 = vmatpush3.msra.mxu0 %v1507_v13  ;;  %1269 = vmatpush3.msra.mxu1 %v1481_v8 }
   0xe   :  { %1239 = vmatmul.mubr.msk.f32.gmra.mxu0 %vm131_vm0, %v126_v14  ;;  %1255 = vmatprep.subr.mxu0 %v1392_v3 }
   0xf   :  { %1241 = vmatprep.mubr.msk.f32.mxu0 %vm131_vm0, %v127_v15  ;;  %1274 = vmatprep.mubr.msk.f32.mxu1 %vm1393_vm1, %v1392_v3 }
  0x10   :  { %1270 = vmatprep.subr.mxu1 %v1392_v3 }
  0x11   :  { %1271 = vmatpush3.msra.mxu1 %v1498_v12 }
  0x12   :  { %1242 = vmatmul.mubr.msk.f32.gmra.mxu0 %vm131_vm0, %v128_v16  ;;  %1272 = vmatprep.subr.mxu1 %v1392_v3 }
  0x13   :  { %1252 = vmatprep.mubr.msk.f32.mxu0 %vm1393_vm1, %v1392_v3  ;;  %1273 = vmatpush3.msra.mxu1 %v1507_v13 }
  0x14   :  { %1288 = vmatprep.subr.mxu1 %v1392_v3 }
  0x16   :  { %1253 = vmatmul.mubr.msk.f32.vlgmr.msra.gmra.mxu0 %vm266_vm4, %v265_v17 }
  0x17   :  { %1256 = vmatpush3.msra.mxu0 %v1468_v5  ;;  %1263 = vmatprep.mubr.msk.f32.mxu0 %vm1393_vm1, %v1392_v3 }
  0x18   :  { %1257 = vmatprep.subr.mxu0 %v1392_v3 }
  0x19   :  { %1258 = vmatpush3.msra.mxu0 %v1481_v8 }
  0x1a   :  { %1259 = vmatprep.subr.mxu0 %v1392_v3 }
  0x1b   :  { %1260 = vmatpush3.msra.mxu0 %v1498_v12 }
  0x1c   :  { %1261 = vmatprep.subr.mxu0 %v1392_v3 }
  0x1d   :  { %1262 = vmatpush3.msra.mxu0 %v1507_v13 }
  0x1e   :  { %1277 = vmatprep.subr.mxu0 %v1392_v3 }
  0xc5   :  { %v117_v20 = vpop.f32.mrf.mxu1 }
  0xc6   :  { %v1234_v18 = vpop.f32.mrf.mxu0  ;;  %v1564_v29 = vadd.f32 %v1127_v27, %v117_v20 }
  0xc7   :  { %v1227_v22 = vpop.f32.mrf.mxu1 }
  0xc8   :  { %v222_v19 = vpop.f32.mrf.mxu0 }
  0xca   :  { %v1237_v21 = vpop.f32.mrf.mxu0 }
  0xcc   :  { %v232_v23 = vpop.f32.mrf.mxu0 }
  0xce   :  { %v1553_v24 = vpop.f32.mrf.mxu0 }
  0xd0   :  { %v1555_v25 = vpop.f32.mrf.mxu0 }
  0xd2   :  { %v1557_v26 = vpop.f32.mrf.mxu0 }
  0xd4   :  { %v1562_v28 = vpop.f32.mrf.mxu0 }
  0xd6   :  { %v336_v30 = vpop.f32.mrf.mxu0 }
  0xd7   :  { %v337_v31 = vadd.f32 %v336_v30, %v222_v19 }
  0xd8   :  { %v1254_v32 = vpop.f32.mrf.mxu0 }
  0xd9   :  { %v340_v33 = vadd.f32 %v337_v31, %v1564_v29 }
  0xdb   :  { %342 = vst.msk [vmem:[#allocation2] sm:$0xff] %vm341_vm5, %v340_v33  ;;  %1264 = vmatmul.mubr.msk.f32.vlgmr.msra.gmra.mxu0 %vm266_vm4, %v340_v33 }
  0xdc   :  { %1278 = vmatpush3.msra.mxu0 %v1468_v5  ;;  %1285 = vmatprep.mubr.msk.f32.mxu0 %vm1393_vm1, %v1392_v3 }
  0xdd   :  { %1279 = vmatprep.subr.mxu0 %v1392_v3 }
  0xde   :  { %1280 = vmatpush3.msra.mxu0 %v1481_v8 }
  0xdf   :  { %1281 = vmatprep.subr.mxu0 %v1392_v3 }
  0xe0   :  { %1282 = vmatpush3.msra.mxu0 %v1498_v12 }
  0xe1   :  { %1283 = vmatprep.subr.mxu0 %v1392_v3 }
  0xe2   :  { %1284 = vmatpush3.msra.mxu0 %v1507_v13  ;;  %v869_v56 = vld [vmem:[#allocation2] sm:$0xff] }
  0xe3   :  { %1299 = vmatprep.subr.mxu0 %v1392_v3 }
 0x19b   :  { %v412_v34 = vpop.f32.mrf.mxu0 }
 0x19c   :  { %v413_v35 = vadd.f32 %v1234_v18, %v412_v34 }
 0x19d   :  { %v1265_v36 = vpop.f32.mrf.mxu0 }
 0x19e   :  { %v416_v37 = vadd.f32 %v413_v35, %v1564_v29 }
 0x1a0   :  { %417 = vst.msk [vmem:[#allocation2 + $0x8] sm:$0xff] %vm341_vm5, %v416_v37  ;;  %1275 = vmatmul.mubr.msk.f32.vlgmr.msra.gmra.mxu1 %vm266_vm4, %v416_v37 }
 0x1a1   :  { %1289 = vmatpush3.msra.mxu1 %v1468_v5  ;;  %1296 = vmatprep.mubr.msk.f32.mxu1 %vm1393_vm1, %v1392_v3 }
 0x1a2   :  { %1290 = vmatprep.subr.mxu1 %v1392_v3 }
 0x1a3   :  { %1291 = vmatpush3.msra.mxu1 %v1481_v8 }
 0x1a4   :  { %1292 = vmatprep.subr.mxu1 %v1392_v3 }
 0x1a5   :  { %1293 = vmatpush3.msra.mxu1 %v1498_v12 }
 0x1a6   :  { %1294 = vmatprep.subr.mxu1 %v1392_v3 }
 0x1a7   :  { %1295 = vmatpush3.msra.mxu1 %v1507_v13  ;;  %v870_v62 = vld [vmem:[#allocation2 + $0x8] sm:$0xff] }
 0x1a8   :  { %1310 = vmatprep.subr.mxu1 %v1392_v3 }
 0x260   :  { %v487_v38 = vpop.f32.mrf.mxu1 }
 0x261   :  { %v488_v39 = vadd.f32 %v487_v38, %v232_v23 }
 0x262   :  { %v1276_v40 = vpop.f32.mrf.mxu1 }
 0x263   :  { %v491_v41 = vadd.f32 %v488_v39, %v1564_v29 }
 0x265   :  { %492 = vst.msk [vmem:[#allocation2 + $0x10] sm:$0xff] %vm341_vm5, %v491_v41  ;;  %1286 = vmatmul.mubr.msk.f32.vlgmr.msra.gmra.mxu0 %vm266_vm4, %v491_v41 }
 0x266   :  { %1300 = vmatpush3.msra.mxu0 %v1468_v5  ;;  %1307 = vmatprep.mubr.msk.f32.mxu0 %vm1393_vm1, %v1392_v3 }
 0x267   :  { %1301 = vmatprep.subr.mxu0 %v1392_v3 }
 0x268   :  { %1302 = vmatpush3.msra.mxu0 %v1481_v8 }
 0x269   :  { %1303 = vmatprep.subr.mxu0 %v1392_v3 }
 0x26a   :  { %1304 = vmatpush3.msra.mxu0 %v1498_v12 }
 0x26b   :  { %1305 = vmatprep.subr.mxu0 %v1392_v3 }
 0x26c   :  { %1306 = vmatpush3.msra.mxu0 %v1507_v13  ;;  %v871_v63 = vld [vmem:[#allocation2 + $0x10] sm:$0xff] }
 0x26d   :  { %1321 = vmatprep.subr.mxu0 %v1392_v3 }
 0x325   :  { %v562_v42 = vpop.f32.mrf.mxu0 }
 0x326   :  { %v563_v43 = vadd.f32 %v1237_v21, %v562_v42 }
 0x327   :  { %v1287_v44 = vpop.f32.mrf.mxu0 }
 0x328   :  { %v566_v45 = vadd.f32 %v563_v43, %v1564_v29 }
 0x32a   :  { %567 = vst.msk [vmem:[#allocation2 + $0x18] sm:$0xff] %vm341_vm5, %v566_v45  ;;  %1297 = vmatmul.mubr.msk.f32.vlgmr.msra.gmra.mxu1 %vm266_vm4, %v566_v45 }
 0x32b   :  { %1311 = vmatpush3.msra.mxu1 %v1468_v5  ;;  %1318 = vmatprep.mubr.msk.f32.mxu1 %vm1393_vm1, %v1392_v3 }
 0x32c   :  { %1312 = vmatprep.subr.mxu1 %v1392_v3 }
 0x32d   :  { %1313 = vmatpush3.msra.mxu1 %v1481_v8 }
 0x32e   :  { %1314 = vmatprep.subr.mxu1 %v1392_v3 }
 0x32f   :  { %1315 = vmatpush3.msra.mxu1 %v1498_v12 }
 0x330   :  { %1316 = vmatprep.subr.mxu1 %v1392_v3 }
 0x331   :  { %1317 = vmatpush3.msra.mxu1 %v1507_v13  ;;  %v872_v0 = vld [vmem:[#allocation2 + $0x18] sm:$0xff] }
 0x332   :  { %1332 = vmatprep.subr.msk.mxu1 %vm47_vm2, %v883_v50 }
 0x3ea   :  { %v637_v46 = vpop.f32.mrf.mxu1 }
 0x3eb   :  { %v638_v47 = vadd.f32 %v637_v46, %v1555_v25 }
 0x3ec   :  { %v1298_v48 = vpop.f32.mrf.mxu1 }
 0x3ed   :  { %v641_v49 = vadd.f32 %v638_v47, %v1564_v29 }
 0x3ef   :  { %642 = vst.msk [vmem:[#allocation2 + $0x20] sm:$0xff] %vm341_vm5, %v641_v49  ;;  %1308 = vmatmul.mubr.msk.f32.vlgmr.msra.gmra.mxu0 %vm266_vm4, %v641_v49 }
 0x3f0   :  { %1322 = vmatpush3.msra.mxu0 %v1468_v5  ;;  %1329 = vmatprep.mubr.msk.f32.mxu0 %vm1393_vm1, %v1392_v3 }
 0x3f1   :  { %1323 = vmatprep.subr.mxu0 %v1392_v3 }
 0x3f2   :  { %1324 = vmatpush3.msra.mxu0 %v1481_v8 }
 0x3f3   :  { %1325 = vmatprep.subr.mxu0 %v1392_v3 }
 0x3f4   :  { %1326 = vmatpush3.msra.mxu0 %v1498_v12 }
 0x3f5   :  { %1327 = vmatprep.subr.mxu0 %v1392_v3 }
 0x3f6   :  { %1328 = vmatpush3.msra.mxu0 %v1507_v13  ;;  %v873_v1 = vld [vmem:[#allocation2 + $0x20] sm:$0xff] }
 0x4af   :  { %v712_v51 = vpop.f32.mrf.mxu0 }
 0x4b0   :  { %v713_v52 = vadd.f32 %v1553_v24, %v712_v51 }
 0x4b1   :  { %v1309_v53 = vpop.f32.mrf.mxu0 }
 0x4b2   :  { %v716_v54 = vadd.f32 %v713_v52, %v1564_v29 }
 0x4b4   :  { %717 = vst.msk [vmem:[#allocation2 + $0x28] sm:$0xff] %vm341_vm5, %v716_v54  ;;  %1319 = vmatmul.mubr.msk.f32.vlgmr.msra.gmra.mxu1 %vm266_vm4, %v716_v54 }
 0x4b5   :  { %1333 = vmatpush3.msk.msra.mxu1 %vm47_vm2, %v883_v50  ;;  %1346 = vmatprep.mubr.msk.f32.mxu1 %vm341_vm5, %v869_v56 }
 0x4b6   :  { %1334 = vmatprep.subr.mxu1 %v882_v55 }
 0x4b7   :  { %1335 = vmatpush3.msra.mxu1 %v882_v55 }
 0x4b8   :  { %1336 = vmatprep.subr.mxu1 %v881_v57 }
 0x4b9   :  { %1337 = vmatpush3.msra.mxu1 %v881_v57 }
 0x4ba   :  { %1338 = vmatprep.subr.mxu1 %v880_v58 }
 0x4bb   :  { %1339 = vmatpush3.msra.mxu1 %v880_v58  ;;  %v874_v2 = vld [vmem:[#allocation2 + $0x28] sm:$0xff] }
 0x4bc   :  { %1340 = vmatprep.subr.mxu1 %v879_v59 }
 0x4bd   :  { %1341 = vmatpush3.msra.mxu1 %v879_v59 }
 0x4be   :  { %1342 = vmatprep.subr.mxu1 %v878_v60 }
 0x4bf   :  { %1343 = vmatpush3.msra.mxu1 %v878_v60 }
 0x4c0   :  { %1344 = vmatprep.subr.mxu1 %v877_v61 }
 0x4c1   :  { %1345 = vmatpush3.msra.mxu1 %v877_v61 }
 0x4c2   :  { %1347 = vmatmul.mubr.msk.f32.vlgmr.msra.gmra.mxu1 %vm341_vm5, %v870_v62 }
 0x4c3   :  { %1349 = vmatprep.mubr.msk.f32.mxu1 %vm341_vm5, %v871_v63 }
 0x4c6   :  { %1350 = vmatmul.mubr.msk.f32.gmra.mxu1 %vm341_vm5, %v872_v0 }
 0x4c7   :  { %1352 = vmatprep.mubr.msk.f32.mxu1 %vm341_vm5, %v873_v1 }
 0x4ca   :  { %1353 = vmatmul.mubr.msk.f32.gmra.mxu1 %vm341_vm5, %v874_v2 }
 0x574   :  { %v787_v3 = vpop.f32.mrf.mxu1 }
 0x575   :  { %v788_v4 = vadd.f32 %v787_v3, %v1562_v28 }
 0x576   :  { %v1320_v5 = vpop.f32.mrf.mxu1 }
 0x577   :  { %v791_v6 = vadd.f32 %v788_v4, %v1564_v29 }
 0x579   :  { %792 = vst.msk [vmem:[#allocation2 + $0x30] sm:$0xff] %vm341_vm5, %v791_v6  ;;  %1330 = vmatmul.mubr.msk.f32.vlgmr.msra.gmra.mxu0 %vm266_vm4, %v791_v6 }
 0x580   :  { %v875_v8 = vld [vmem:[#allocation2 + $0x30] sm:$0xff] }
 0x581   :  { %1355 = vmatprep.mubr.msk.f32.mxu1 %vm341_vm5, %v875_v8 }
 0x582   :  { %v1348_v9 = vpop.f32.mrf.mxu1 }
 0x583   :  { %v1671_v10 = vadd.f32 %v1348_v9, %v1146_v7 }
 0x584   :  { %v984_v11 = vpop.f32.mrf.mxu1 }
 0x585   :  { %1025 = vmax.xlane.f32.xlu0 %v1671_v10  ;;  %v1674_v13 = vadd.f32 %v1146_v7, %v984_v11 }
 0x586   :  { %v1351_v12 = vpop.f32.mrf.mxu1 }
 0x587   :  { %v1676_v14 = vadd.f32 %v1351_v12, %v1146_v7 }
 0x588   :  { %v994_v15 = vpop.f32.mrf.mxu1 }
 0x589   :  { %1029 = vmax.xlane.f32.xlu1 %v1676_v14  ;;  %1023 = vmax.xlane.f32.xlu0 %v1674_v13  ;;  %v1680_v17 = vadd.f32 %v1146_v7, %v994_v15 }
 0x58a   :  { %v1354_v16 = vpop.f32.mrf.mxu1 }
 0x58b   :  { %v1685_v20 = vadd.f32 %v1354_v16, %v1146_v7 }
 0x58c   :  { %v1004_v18 = vpop.f32.mrf.mxu1 }
 0x58d   :  { %v1682_v19 = vadd.f32 %v1146_v7, %v1004_v18  ;;  %1027 = vmax.xlane.f32.xlu1 %v1680_v17 }
 0x58f   :  { %1031 = vmax.xlane.f32.xlu0 %v1682_v19 }
 0x591   :  { %1033 = vmax.xlane.f32.xlu1 %v1685_v20 }
 0x60e   :  { %v1697_v27 = vpop.xlane.xlu0 %1025 }
 0x612   :  { %v1699_v28 = vpop.xlane.xlu1 %1029  ;;  %v1701_v30 = vpop.xlane.xlu0 %1023 }
 0x613   :  { %v1039_v31 = vsub.f32 %v1674_v13, %v1701_v30  ;;  %v1042_v33 = vsub.f32 %v1676_v14, %v1699_v28 }
 0x615   :  { %v1047_v35 = vmul.f32 1.442695, %v1039_v31  ;;  %v1053_v38 = vmul.f32 1.442695, %v1042_v33 }
 0x618   :  { %v1715_v37 = vpop.xlane.xlu0 %1031 }
 0x619   :  { %v1043_v41 = vsub.f32 %v1682_v19, %v1715_v37 }
 0x61b   :  { %v1055_v43 = vmul.f32 1.442695, %v1043_v41 }
 0x639   :  { %v862_v21 = vpop.f32.mrf.mxu0 }
 0x63a   :  { %v863_v22 = vadd.f32 %v1557_v26, %v862_v21  ;;  %v1703_v26 = vpop.xlane.xlu1 %1027 }
 0x63b   :  { %v1331_v23 = vpop.f32.mrf.mxu0  ;;  %v1041_v36 = vsub.f32 %v1680_v17, %v1703_v26 }
 0x63c   :  { %v866_v24 = vadd.f32 %v863_v22, %v1564_v29  ;;  %v1040_v29 = vsub.f32 %v1671_v10, %v1697_v27 }
 0x63d   :  { %v1051_v40 = vmul.f32 1.442695, %v1041_v36 }
 0x63e   :  { %867 = vst.msk [vmem:[#allocation2 + $0x38] sm:$0xff] %vm341_vm5, %v866_v24  ;;  %v1049_v32 = vmul.f32 1.442695, %v1040_v29  ;;  %v1711_v34 = vpop.xlane.xlu1 %1033 }
 0x63f   :  { %868 = vst.msk [vmem:[%s1780_s10] sm:$0xff] %vm266_vm4, %v866_v24  ;;  %v1044_v39 = vsub.f32 %v1685_v20, %v1711_v34 }
 0x640   :  { %1360 = vpow2.f32 %v1049_v32 }
 0x641   :  { %1362 = vpow2.f32 %v1047_v35  ;;  %v1057_v42 = vmul.f32 1.442695, %v1044_v39 }
 0x642   :  { %1364 = vpow2.f32 %v1053_v38 }
 0x643   :  { %1366 = vpow2.f32 %v1051_v40 }
 0x644   :  { %1368 = vpow2.f32 %v1057_v42 }
 0x645   :  { %v876_v25 = vld [vmem:[#allocation2 + $0x38] sm:$0xff]  ;;  %1370 = vpow2.f32 %v1055_v43 }
 0x646   :  { %1356 = vmatmul.mubr.msk.f32.gmra.mxu1 %vm341_vm5, %v876_v25 }
 0x64d   :  { %v1361_v48 = vpop.eup %1360 }
 0x64e   :  { %v1363_v49 = vpop.eup %1362 }
 0x64f   :  { %v1365_v50 = vpop.eup %1364 }
 0x650   :  { %v1367_v51 = vpop.eup %1366 }
 0x651   :  { %v1369_v52 = vpop.eup %1368 }
 0x652   :  { %v1371_v53 = vpop.eup %1370 }
 0x706   :  { %v1357_v44 = vpop.f32.mrf.mxu1 }
 0x707   :  { %v1721_v45 = vadd.f32 %v1357_v44, %v1146_v7 }
 0x708   :  { %v1014_v46 = vpop.f32.mrf.mxu1 }
 0x709   :  { %v1723_v47 = vadd.f32 %v1146_v7, %v1014_v46  ;;  %1037 = vmax.xlane.f32.xlu1 %v1721_v45 }
 0x70b   :  { %1035 = vmax.xlane.f32.xlu0 %v1723_v47 }
 0x70d   :  { %1065 = vadd.xlane.f32.xlu1 %v1361_v48 }
 0x70f   :  { %1063 = vadd.xlane.f32.xlu0 %v1363_v49 }
 0x711   :  { %1069 = vadd.xlane.f32.xlu1 %v1365_v50 }
 0x713   :  { %1067 = vadd.xlane.f32.xlu0 %v1367_v51 }
 0x715   :  { %1073 = vadd.xlane.f32.xlu1 %v1369_v52 }
 0x717   :  { %1071 = vadd.xlane.f32.xlu0 %v1371_v53 }
 0x792   :  { %v1038_v54 = vpop.xlane.xlu1 %1037 }
 0x793   :  { %v1046_v55 = vsub.f32 %v1721_v45, %v1038_v54 }
 0x794   :  { %v1728_v56 = vpop.xlane.xlu0 %1035 }
 0x795   :  { %v1061_v57 = vmul.f32 1.442695, %v1046_v55  ;;  %v1045_v58 = vsub.f32 %v1723_v47, %v1728_v56 }
 0x796   :  { %v1066_v59 = vpop.xlane.xlu1 %1065 }
 0x797   :  { %1372 = vpow2.f32 %v1061_v57  ;;  %v1059_v60 = vmul.f32 1.442695, %v1045_v58 }
 0x798   :  { %1374 = vlog2.f32 %v1066_v59  ;;  %v1064_v61 = vpop.xlane.xlu0 %1063 }
 0x799   :  { %1376 = vpow2.f32 %v1059_v60 }
 0x79a   :  { %1378 = vlog2.f32 %v1064_v61  ;;  %v1070_v62 = vpop.xlane.xlu1 %1069 }
 0x79b   :  { %1380 = vlog2.f32 %v1070_v62 }
 0x79c   :  { %v1068_v63 = vpop.xlane.xlu0 %1067 }
 0x79d   :  { %1382 = vlog2.f32 %v1068_v63 }
 0x79e   :  { %v1074_v0 = vpop.xlane.xlu1 %1073 }
 0x79f   :  { %1384 = vlog2.f32 %v1074_v0 }
 0x7a0   :  { %v1072_v1 = vpop.xlane.xlu0 %1071 }
 0x7a1   :  { %1386 = vlog2.f32 %v1072_v1 }
 0x7a4   :  { %v1373_v2 = vpop.eup %1372 }
 0x7a5   :  { %v1375_v3 = vpop.eup %1374  ;;  %1077 = vadd.xlane.f32.xlu1 %v1373_v2 }
 0x7a6   :  { %v1377_v4 = vpop.eup %1376  ;;  %v1082_v5 = vmul.f32 0.6931472, %v1375_v3 }
 0x7a7   :  { %v1379_v6 = vpop.eup %1378  ;;  %1075 = vadd.xlane.f32.xlu0 %v1377_v4 }
 0x7a8   :  { %v1381_v7 = vpop.eup %1380  ;;  %v1096_v8 = vadd.f32 %v1082_v5, %v1697_v27  ;;  %v1080_v9 = vmul.f32 0.6931472, %v1379_v6 }
 0x7a9   :  { %v1086_v11 = vmul.f32 0.6931472, %v1381_v7 }
 0x7aa   :  { %v1383_v12 = vpop.eup %1382  ;;  %v1104_v15 = vsub.f32 %v1671_v10, %v1096_v8  ;;  %v1095_v16 = vadd.f32 %v1080_v9, %v1701_v30 }
 0x7ab   :  { %v1098_v18 = vadd.f32 %v1086_v11, %v1699_v28  ;;  %v1084_v21 = vmul.f32 0.6931472, %v1383_v12 }
 0x7ac   :  { %v1385_v22 = vpop.eup %1384  ;;  %1112 = vst [vmem:[%s1781_s9 + $0x8] sm:$0xff] %v1104_v15  ;;  %v1103_v23 = vsub.f32 %v1674_v13, %v1095_v16 }
 0x7ad   :  { %v1106_v24 = vsub.f32 %v1676_v14, %v1098_v18  ;;  %v1097_v25 = vadd.f32 %v1084_v21, %v1703_v26  ;;  %v1090_v27 = vmul.f32 0.6931472, %v1385_v22 }
 0x7ae   :  { %v1387_v29 = vpop.eup %1386  ;;  %1111 = vst [vmem:[%s1781_s9] sm:$0xff] %v1103_v23 }
 0x7af   :  { %1114 = vst [vmem:[%s1781_s9 + $0x18] sm:$0xff] %v1106_v24  ;;  %v1105_v10 = vsub.f32 %v1680_v17, %v1097_v25  ;;  %v1100_v28 = vadd.f32 %v1090_v27, %v1711_v34  ;;  %v1088_v30 = vmul.f32 0.6931472, %v1387_v29 }
 0x7b1   :  { %1113 = vst [vmem:[%s1781_s9 + $0x10] sm:$0xff] %v1105_v10  ;;  %v1108_v13 = vsub.f32 %v1685_v20, %v1100_v28  ;;  %v1099_v14 = vadd.f32 %v1088_v30, %v1715_v37 }
 0x7b3   :  { %1116 = vst [vmem:[%s1781_s9 + $0x28] sm:$0xff] %v1108_v13  ;;  %v1107_v26 = vsub.f32 %v1682_v19, %v1099_v14 }
 0x7b5   :  { %1115 = vst [vmem:[%s1781_s9 + $0x20] sm:$0xff] %v1107_v26 }
 0x82e   :  { %v1078_v17 = vpop.xlane.xlu1 %1077 }
 0x82f   :  { %1388 = vlog2.f32 %v1078_v17 }
 0x830   :  { %v1076_v31 = vpop.xlane.xlu0 %1075 }
 0x831   :  { %1390 = vlog2.f32 %v1076_v31 }
 0x83c   :  { %v1389_v32 = vpop.eup %1388 }
 0x83d   :  { %v1094_v33 = vmul.f32 0.6931472, %v1389_v32 }
 0x83e   :  { %v1391_v34 = vpop.eup %1390 }
 0x83f   :  { %v1102_v20 = vadd.f32 %v1094_v33, %v1038_v54  ;;  %v1092_v35 = vmul.f32 0.6931472, %v1391_v34 }
 0x841   :  { %v1110_v36 = vsub.f32 %v1721_v45, %v1102_v20  ;;  %v1101_v37 = vadd.f32 %v1092_v35, %v1728_v56 }
 0x843   :  { %1118 = vst [vmem:[%s1781_s9 + $0x38] sm:$0xff] %v1110_v36  ;;  %v1109_v19 = vsub.f32 %v1723_v47, %v1101_v37 }
 0x845   :  { %1117 = vst [vmem:[%s1781_s9 + $0x30] sm:$0xff] %v1109_v19 }

</bundles_post_ra>
